<compile_context>
chip_gen: v7x
topology: tpu7x:2x2x1
jax: 0.10.0
libtpu: 0.0.40
codegen_flags: <defaults>
</compile_context>

<pallas_src>
import functools

import jax
import jax.numpy as jnp
import numpy as np
from jax import lax
from jax.experimental import pallas as pl
from jax.experimental.pallas import tpu as pltpu


def _round_up(x, m):
    return ((x + m - 1) // m) * m


def lore_kernel(alpha_ref, x_ref, w_ref, v_ref, vsft_ref, out_ref, *,
                n_valid, block_n):
    f32 = jnp.float32
    c = pl.program_id(0)   # class index        (parallel axis)
    n = pl.program_id(1)   # sample-tile index  (reduction axis, last)

    alpha = alpha_ref[0, 0]

    # ---- softmax over the basis axis for this class's row of W ---------------
    w_row = w_ref[pl.ds(c, 1), :].astype(f32)                    # (1, B)
    w_max = jnp.max(w_row, axis=1, keepdims=True)
    e = jnp.exp(w_row - w_max)
    sm = e / jnp.sum(e, axis=1, keepdims=True)                   # (1, B)

    # ---- V_w row for this class: contract over B directly (no .T) -> MXU -----
    v = v_ref[...].astype(f32)                                   # (Fp, B)
    v_row = lax.dot_general(sm, v, (((1,), (1,)), ((), ())),
                            preferred_element_type=f32)          # (1, Fp)
    v_row = v_row * (1.0 / 100.0)   # fold the /100 here (C*F work, not C*N)

    # ---- logits for this (class, sample-tile): MXU contraction over F --------
    x = x_ref[...]                                               # (block_n, Fp), input dtype
    logits = lax.dot_general(v_row.astype(x.dtype), x,
                             (((1,), (1,)), ((), ())),
                             preferred_element_type=f32)         # (1, block_n)  lane-dense

    # ---- numerically stable log(sigmoid(z)) = min(z,0) - log(1 + exp(-|z|)) ---
    log_sig = jnp.minimum(logits, 0.0) - jnp.log(1.0 + jnp.exp(-jnp.abs(logits)))

    # mask columns that are only N-padding
    col_id = lax.broadcasted_iota(jnp.int32, (1, block_n), 1) + n * block_n
    log_sig = jnp.where(col_id < n_valid, log_sig, 0.0)

    partial_nll = jnp.sum(log_sig) * (-1.0 / float(n_valid))     # rank-0 f32

    # positions inside the per-class (8,128) output tile
    sub = lax.broadcasted_iota(jnp.int32, (8, 128), 0)
    lane = lax.broadcasted_iota(jnp.int32, (8, 128), 1)
    at_nll = (sub == 0) & (lane == 0)
    at_reg = (sub == 0) & (lane == 1)

    @pl.when(n == 0)
    def _init():
        # reg = alpha * sum_j ||V[:, j] - V_sft||^2  (F-padding rows are zero)
        diff = v - vsft_ref[...].astype(f32)                     # (Fp, B) via broadcast
        ssq = jnp.sum(diff * diff)
        reg = jnp.where(alpha > 0.0, alpha * ssq, 0.0)           # matches `if alpha > 0`
        out_ref[...] = jnp.where(at_reg, reg, 0.0).astype(out_ref.dtype)

    out_ref[...] = out_ref[...] + jnp.where(at_nll, partial_nll, 0.0).astype(out_ref.dtype)


def lore_forward(X, W, V, V_sft, alpha, *, block_n=None):
    """Pallas TPU implementation of LoRe.forward.

    X:     (C, N, F)  class-major samples (f32 or bf16; bf16 halves HBM traffic)
    W:     (C, B), V: (F, B), V_sft: (F,), alpha: python/0-d scalar
    Returns (nll, reg) as f32 scalars.
    """
    C, N, F = X.shape
    B = W.shape[1]

    Fp = _round_up(F, 128)                       # lane-dense feature axis
    if block_n is None:
        block_n = min(512, _round_up(N, 8))      # sublane-aligned sample tile
    block_n = max(8, _round_up(block_n, 8))
    nt = pl.cdiv(N, block_n)
    Np = nt * block_n

    X_p = jnp.pad(X, ((0, 0), (0, Np - N), (0, Fp - F)))          # keeps input dtype
    V_p = jnp.pad(V.astype(jnp.float32), ((0, Fp - F), (0, 0)))
    vsft_p = jnp.pad(V_sft.astype(jnp.float32).reshape(F, 1), ((0, Fp - F), (0, 0)))
    W_f = W.astype(jnp.float32)
    alpha_arr = jnp.asarray(alpha, dtype=jnp.float32).reshape(1, 1)

    kernel = functools.partial(lore_kernel, n_valid=N, block_n=block_n)

    out = pl.pallas_call(
        kernel,
        out_shape=jax.ShapeDtypeStruct((C, 8, 128), jnp.float32),
        grid=(C, nt),
        in_specs=[
            pl.BlockSpec(memory_space=pltpu.MemorySpace.SMEM),           # alpha (1,1)
            pl.BlockSpec((None, block_n, Fp), lambda c, n: (c, n, 0)),   # X tile
            pl.BlockSpec((C, B), lambda c, n: (0, 0)),                   # W  (resident)
            pl.BlockSpec((Fp, B), lambda c, n: (0, 0)),                  # V  (resident)
            pl.BlockSpec((Fp, 1), lambda c, n: (0, 0)),                  # V_sft (resident)
        ],
        out_specs=pl.BlockSpec((None, 8, 128), lambda c, n: (c, 0, 0)),  # per-class tile
        compiler_params=pltpu.CompilerParams(
            dimension_semantics=("parallel", "arbitrary"),
            vmem_limit_bytes=32 * 1024 * 1024,
        ),
    )(alpha_arr, X_p, W_f, V_p, vsft_p)

    nll = jnp.sum(out[:, 0, 0])   # tiny C-element reduce outside the kernel
    reg = out[0, 0, 1]
    return nll, reg


def lore_forward_ref(X, W, V, V_sft, alpha):
    """Pure-JAX reference mirroring the PyTorch forward exactly."""
    sm = jax.nn.softmax(W.astype(jnp.float32), axis=1)
    V_w = V.astype(jnp.float32) @ sm.T                            # (F, C)
    logits = jnp.einsum('cnf,fc->cn', X.astype(jnp.float32), V_w) / 100.0
    ll = jnp.log(jax.nn.sigmoid(logits))
    nll = jnp.sum(-jnp.sum(ll, axis=1) / X.shape[1])
    reg = jnp.where(alpha > 0, alpha * jnp.sum((V - V_sft[:, None]) ** 2), 0.0)
    return nll, reg


if __name__ == "__main__":
    num_classes = 4          # C
    n_per_class = 16         # N (len(x) per class)
    num_features = 32        # F
    num_basis_vectors = 8    # B
    alpha = 0.1

    key = jax.random.PRNGKey(0)
    kx, kw, kv, ks = jax.random.split(key, 4)

    X = jax.random.normal(kx, (num_classes, n_per_class, num_features), dtype=jnp.float32)
    W = jax.random.normal(kw, (num_classes, num_basis_vectors), dtype=jnp.float32)
    V = jax.random.normal(kv, (num_features, num_basis_vectors), dtype=jnp.float32)
    V_sft = jax.random.normal(ks, (num_features,), dtype=jnp.float32)

    nll, reg = lore_forward(X, W, V, V_sft, alpha)
    nll = jax.block_until_ready(nll)
    reg = jax.block_until_ready(reg)

    nll_ref, reg_ref = lore_forward_ref(X, W, V, V_sft, alpha)
    # MXU f32 matmuls may be decomposed into bf16 passes -> modest tolerance on nll.
    np.testing.assert_allclose(np.asarray(nll), np.asarray(nll_ref), rtol=1e-4, atol=5e-4)
    np.testing.assert_allclose(np.asarray(reg), np.asarray(reg_ref), rtol=1e-5, atol=1e-5)

    # bf16-X path (halves HBM/VMEM traffic; native bf16 MXU on v6e/v7x).
    nll_bf, _ = lore_forward(X.astype(jnp.bfloat16), W, V, V_sft, alpha)
    nll_bf = jax.block_until_ready(nll_bf)
    np.testing.assert_allclose(np.asarray(nll_bf), np.asarray(nll_ref), rtol=2e-2, atol=2e-2)

    print("KERNEL_OK")
</pallas_src>

<mosaic_0001>
module attributes {stable_mosaic.version = 11 : i64} {
  func.func @lore_kernel(%arg0: i32, %arg1: i32, %arg2: memref<1x1xf32, #tpu.memory_space<smem>>, %arg3: memref<1x16x128xf32, #tpu.memory_space<vmem>>, %arg4: memref<4x8xf32, #tpu.memory_space<vmem>>, %arg5: memref<128x8xf32, #tpu.memory_space<vmem>>, %arg6: memref<128x1xf32, #tpu.memory_space<vmem>>, %arg7: memref<1x8x128xf32, #tpu.memory_space<vmem>>) attributes {dimension_semantics = [#tpu.dimension_semantics<parallel>, #tpu.dimension_semantics<arbitrary>], iteration_bounds = array<i64: 4, 1>, scalar_prefetch = 0 : i64, scratch_operands = 0 : i64, tpu.core_type = #tpu.core_type<tc>, window_params = [{transform_indices = @transform_0, window_bounds = array<i64: 1, 1>}, {transform_indices = @transform_1, window_bounds = array<i64: 1, 16, 128>}, {pipeline_mode = #tpu.pipeline_mode<synchronous>, transform_indices = @transform_2, window_bounds = array<i64: 4, 8>}, {pipeline_mode = #tpu.pipeline_mode<synchronous>, transform_indices = @transform_3, window_bounds = array<i64: 128, 8>}, {pipeline_mode = #tpu.pipeline_mode<synchronous>, transform_indices = @transform_4, window_bounds = array<i64: 128, 1>}, {transform_indices = @transform_5, window_bounds = array<i64: 1, 8, 128>}]} {
    %c0 = arith.constant 0 : index
    %c0_0 = arith.constant 0 : index
    %0 = memref.load %arg2[%c0, %c0_0] : memref<1x1xf32, #tpu.memory_space<smem>>
    %1 = arith.index_cast %arg0 : i32 to index
    %c0_1 = arith.constant 0 : index
    %2 = vector.load %arg4[%1, %c0_1] : memref<4x8xf32, #tpu.memory_space<vmem>>, vector<1x8xf32>
    %cst = arith.constant dense<0xFF800000> : vector<1xf32>
    %3 = vector.multi_reduction <maximumf>, %2, %cst [1] : vector<1x8xf32> to vector<1xf32>
    %4 = vector.shape_cast %3 : vector<1xf32> to vector<1x1xf32>
    %5 = vector.broadcast %4 : vector<1x1xf32> to vector<1x8xf32>
    %6 = arith.subf %2, %5 : vector<1x8xf32>
    %7 = math.exp %6 : vector<1x8xf32>
    %cst_2 = arith.constant dense<0.000000e+00> : vector<1xf32>
    %8 = vector.multi_reduction <add>, %7, %cst_2 [1] : vector<1x8xf32> to vector<1xf32>
    %9 = vector.shape_cast %8 : vector<1xf32> to vector<1x1xf32>
    %10 = vector.broadcast %9 : vector<1x1xf32> to vector<1x8xf32>
    %11 = arith.divf %7, %10 : vector<1x8xf32>
    %c0_3 = arith.constant 0 : index
    %c0_4 = arith.constant 0 : index
    %12 = vector.load %arg5[%c0_3, %c0_4] : memref<128x8xf32, #tpu.memory_space<vmem>>, vector<128x8xf32>
    %cst_5 = arith.constant dense<0.000000e+00> : vector<1x128xf32>
    %13 = tpu.matmul %11, %12, %cst_5 {dimension_numbers = #tpu.dot_dimension_numbers<[1], [1], [0], [0], [0, 0, 1, 0], [], []>} : vector<1x8xf32>, vector<128x8xf32>, vector<1x128xf32> -> vector<1x128xf32>
    %cst_6 = arith.constant 0.00999999977 : f32
    %14 = vector.broadcast %cst_6 : f32 to vector<1x128xf32>
    %15 = arith.mulf %13, %14 : vector<1x128xf32>
    %c0_7 = arith.constant 0 : index
    %c0_8 = arith.constant 0 : index
    %c0_9 = arith.constant 0 : index
    %16 = vector.load %arg3[%c0_7, %c0_8, %c0_9] : memref<1x16x128xf32, #tpu.memory_space<vmem>>, vector<1x16x128xf32>
    %17 = vector.shape_cast %16 : vector<1x16x128xf32> to vector<16x128xf32>
    %cst_10 = arith.constant dense<0.000000e+00> : vector<1x16xf32>
    %18 = tpu.matmul %15, %17, %cst_10 {dimension_numbers = #tpu.dot_dimension_numbers<[1], [1], [0], [0], [0, 0, 1, 0], [], []>} : vector<1x128xf32>, vector<16x128xf32>, vector<1x16xf32> -> vector<1x16xf32>
    %cst_11 = arith.constant 0.000000e+00 : f32
    %19 = vector.broadcast %cst_11 : f32 to vector<1x16xf32>
    %20 = arith.minimumf %18, %19 : vector<1x16xf32>
    %21 = math.absf %18 : vector<1x16xf32>
    %cst_12 = arith.constant 0.000000e+00 : f32
    %22 = vector.broadcast %cst_12 : f32 to vector<1x16xf32>
    %23 = arith.subf %22, %21 : vector<1x16xf32>
    %24 = math.exp %23 : vector<1x16xf32>
    %cst_13 = arith.constant 1.000000e+00 : f32
    %25 = vector.broadcast %cst_13 : f32 to vector<1x16xf32>
    %26 = arith.addf %25, %24 : vector<1x16xf32>
    %27 = math.log %26 : vector<1x16xf32>
    %28 = arith.subf %20, %27 : vector<1x16xf32>
    %29 = tpu.iota {dimensions = array<i32: 1>} : vector<1x16xi32>
    %c16_i32 = arith.constant 16 : i32
    %30 = arith.muli %arg1, %c16_i32 : i32
    %31 = vector.broadcast %30 : i32 to vector<1x16xi32>
    %32 = arith.addi %29, %31 : vector<1x16xi32>
    %c16_i32_14 = arith.constant 16 : i32
    %33 = vector.broadcast %c16_i32_14 : i32 to vector<1x16xi32>
    %34 = arith.cmpi slt, %32, %33 : vector<1x16xi32>
    %cst_15 = arith.constant 0.000000e+00 : f32
    %35 = vector.broadcast %cst_15 : f32 to vector<1x16xf32>
    %36 = arith.select %34, %28, %35 : vector<1x16xi1>, vector<1x16xf32>
    %37 = vector.shape_cast %36 : vector<1x16xf32> to vector<1x1x16xf32>
    %cst_16 = arith.constant dense<0.000000e+00> : vector<1xf32>
    %38 = vector.multi_reduction <add>, %37, %cst_16 [1, 2] : vector<1x1x16xf32> to vector<1xf32>
    %39 = vector.shape_cast %38 : vector<1xf32> to vector<1x1x1xf32>
    %40 = vector.extract %39[0, 0, 0] : f32 from vector<1x1x1xf32>
    %cst_17 = arith.constant -6.250000e-02 : f32
    %41 = arith.mulf %40, %cst_17 : f32
    %42 = tpu.iota {dimensions = array<i32: 0>} : vector<8x128xi32>
    %43 = tpu.iota {dimensions = array<i32: 1>} : vector<8x128xi32>
    %c0_i32 = arith.constant 0 : i32
    %44 = vector.broadcast %c0_i32 : i32 to vector<8x128xi32>
    %45 = arith.cmpi eq, %42, %44 : vector<8x128xi32>
    %c0_i32_18 = arith.constant 0 : i32
    %46 = vector.broadcast %c0_i32_18 : i32 to vector<8x128xi32>
    %47 = arith.cmpi eq, %43, %46 : vector<8x128xi32>
    %48 = arith.andi %45, %47 : vector<8x128xi1>
    %c0_i32_19 = arith.constant 0 : i32
    %49 = vector.broadcast %c0_i32_19 : i32 to vector<8x128xi32>
    %50 = arith.cmpi eq, %42, %49 : vector<8x128xi32>
    %c1_i32 = arith.constant 1 : i32
    %51 = vector.broadcast %c1_i32 : i32 to vector<8x128xi32>
    %52 = arith.cmpi eq, %43, %51 : vector<8x128xi32>
    %53 = arith.andi %50, %52 : vector<8x128xi1>
    %c0_i32_20 = arith.constant 0 : i32
    %54 = arith.cmpi eq, %arg1, %c0_i32_20 : i32
    %55 = arith.extui %54 : i1 to i32
    %c0_i32_21 = arith.constant 0 : i32
    %56 = arith.cmpi ne, %55, %c0_i32_21 : i32
    scf.if %56 {
      %c0_29 = arith.constant 0 : index
      %c0_30 = arith.constant 0 : index
      %66 = vector.load %arg6[%c0_29, %c0_30] : memref<128x1xf32, #tpu.memory_space<vmem>>, vector<128x1xf32>
      %67 = vector.broadcast %66 : vector<128x1xf32> to vector<128x8xf32>
      %68 = arith.subf %12, %67 : vector<128x8xf32>
      %69 = arith.mulf %68, %68 : vector<128x8xf32>
      %70 = vector.shape_cast %69 : vector<128x8xf32> to vector<1x128x8xf32>
      %cst_31 = arith.constant dense<0.000000e+00> : vector<1xf32>
      %71 = vector.multi_reduction <add>, %70, %cst_31 [1, 2] : vector<1x128x8xf32> to vector<1xf32>
      %72 = vector.shape_cast %71 : vector<1xf32> to vector<1x1x1xf32>
      %73 = vector.extract %72[0, 0, 0] : f32 from vector<1x1x1xf32>
      %cst_32 = arith.constant 0.000000e+00 : f32
      %74 = arith.cmpf ogt, %0, %cst_32 : f32
      %75 = arith.mulf %0, %73 : f32
      %cst_33 = arith.constant 0.000000e+00 : f32
      %76 = arith.select %74, %75, %cst_33 : f32
      %cst_34 = arith.constant 0.000000e+00 : f32
      %77 = vector.broadcast %76 : f32 to vector<8x128xf32>
      %78 = vector.broadcast %cst_34 : f32 to vector<8x128xf32>
      %79 = arith.select %53, %77, %78 : vector<8x128xi1>, vector<8x128xf32>
      %c0_35 = arith.constant 0 : index
      %c0_36 = arith.constant 0 : index
      %c0_37 = arith.constant 0 : index
      %80 = vector.load %arg7[%c0_35, %c0_36, %c0_37] : memref<1x8x128xf32, #tpu.memory_space<vmem>>, vector<1x8x128xf32>
      %81 = vector.shape_cast %80 : vector<1x8x128xf32> to vector<8x128xf32>
      %82 = vector.shape_cast %79 : vector<8x128xf32> to vector<1x8x128xf32>
      tpu.vector_store %arg7[%c0_35, %c0_36, %c0_37], %82 {strides = array<i32>} : memref<1x8x128xf32, #tpu.memory_space<vmem>>, vector<1x8x128xf32>,
    } else {
    }
    %c0_22 = arith.constant 0 : index
    %c0_23 = arith.constant 0 : index
    %c0_24 = arith.constant 0 : index
    %57 = vector.load %arg7[%c0_22, %c0_23, %c0_24] : memref<1x8x128xf32, #tpu.memory_space<vmem>>, vector<1x8x128xf32>
    %58 = vector.shape_cast %57 : vector<1x8x128xf32> to vector<8x128xf32>
    %cst_25 = arith.constant 0.000000e+00 : f32
    %59 = vector.broadcast %41 : f32 to vector<8x128xf32>
    %60 = vector.broadcast %cst_25 : f32 to vector<8x128xf32>
    %61 = arith.select %48, %59, %60 : vector<8x128xi1>, vector<8x128xf32>
    %62 = arith.addf %58, %61 : vector<8x128xf32>
    %c0_26 = arith.constant 0 : index
    %c0_27 = arith.constant 0 : index
    %c0_28 = arith.constant 0 : index
    %63 = vector.load %arg7[%c0_26, %c0_27, %c0_28] : memref<1x8x128xf32, #tpu.memory_space<vmem>>, vector<1x8x128xf32>
    %64 = vector.shape_cast %63 : vector<1x8x128xf32> to vector<8x128xf32>
    %65 = vector.shape_cast %62 : vector<8x128xf32> to vector<1x8x128xf32>
    tpu.vector_store %arg7[%c0_26, %c0_27, %c0_28], %65 {strides = array<i32>} : memref<1x8x128xf32, #tpu.memory_space<vmem>>, vector<1x8x128xf32>,
    return
  }
  func.func @transform_0(%arg0: i32, %arg1: i32) -> (i32, i32) {
    %c0_i32 = arith.constant 0 : i32
    %c0_i32_0 = arith.constant 0 : i32
    %c0_i32_1 = arith.constant 0 : i32
    return %c0_i32, %c0_i32_0 : i32, i32
  }
  func.func @transform_1(%arg0: i32, %arg1: i32) -> (i32, i32, i32) {
    %c0_i32 = arith.constant 0 : i32
    %c0_i32_0 = arith.constant 0 : i32
    return %arg0, %arg1, %c0_i32 : i32, i32, i32
  }
  func.func @transform_2(%arg0: i32, %arg1: i32) -> (i32, i32) {
    %c0_i32 = arith.constant 0 : i32
    %c0_i32_0 = arith.constant 0 : i32
    %c0_i32_1 = arith.constant 0 : i32
    return %c0_i32, %c0_i32_0 : i32, i32
  }
  func.func @transform_3(%arg0: i32, %arg1: i32) -> (i32, i32) {
    %c0_i32 = arith.constant 0 : i32
    %c0_i32_0 = arith.constant 0 : i32
    %c0_i32_1 = arith.constant 0 : i32
    return %c0_i32, %c0_i32_0 : i32, i32
  }
  func.func @transform_4(%arg0: i32, %arg1: i32) -> (i32, i32) {
    %c0_i32 = arith.constant 0 : i32
    %c0_i32_0 = arith.constant 0 : i32
    %c0_i32_1 = arith.constant 0 : i32
    return %c0_i32, %c0_i32_0 : i32, i32
  }
  func.func @transform_5(%arg0: i32, %arg1: i32) -> (i32, i32, i32) {
    %c0_i32 = arith.constant 0 : i32
    %c0_i32_0 = arith.constant 0 : i32
    %c0_i32_1 = arith.constant 0 : i32
    return %arg0, %c0_i32, %c0_i32_0 : i32, i32, i32
  }
}

</mosaic_0001>

<bundles_post_ra>
// kernel: tpu_custom_call.1
= control target key start
LH: loop header
LB: loop body
LE: loop exit
PB: predicated region body
PF: predicated region fallthrough
CT: control target
= control target key end

     0   :  { %s1419_s0 = inlined_call_operand.<no memory space> [shape: f32[1,1], index: 0, kind: input, shape index: {}]   ;;  %s1420_s1 = inlined_call_operand.vmem [shape: f32[4,16,128], index: 1, kind: input, shape index: {}]   ;;  %s1421_s2 = inlined_call_operand.vmem [shape: f32[4,8], index: 2, kind: input, shape index: {}]   ;;  %s1422_s3 = inlined_call_operand.vmem [shape: f32[128,8], index: 3, kind: input, shape index: {}]   ;;  %s1423_s4 = inlined_call_operand.vmem [shape: f32[128,1], index: 4, kind: input, shape index: {}]   ;;  %s1424_s5 = inlined_call_operand.hbm [shape: f32[4,8,128], index: 5, kind: output, shape index: {}]  }
   0x1   :  { %10 = sst [smem:[#allocation2]] %s1419_s0 }
   0x2   :  { %11 = vsyncpa [#allocation4], 0 }
   0x3   :  { %13 = vsyncpa [#allocation4 + $0x1], 0  ;;  %s1102_s20 = smov 0   ;;  %s1104_s21 = smov 0  }
   0x4   :  { %s1106_s22 = smov 0   ;;  %s1108_s23 = smov 0  }
   0x5   :  { %s1110_s24 = smov 0   ;;  %s1112_s25 = smov 0  }
   0x6 LB: > { %s784_s0 = sadd.s32 4294967295, %s1062_s25   ;;  %s785_s26 = sadd.s32 4294967294, %s1062_s25   ;;  %s1062_s25 = sphi %s1112_s25, %s19_s25   ;;  %s1058_s24 = sphi %s1110_s24, %s1433_s24   ;;  %s1054_s23 = sphi %s1108_s23, %s1432_s23   ;;  %s1050_s22 = sphi %s1106_s22, %s1431_s22   ;;  %s1046_s21 = sphi %s1104_s21, %s1430_s21   ;;  %s1042_s20 = sphi %s1102_s20, %s1429_s20  }
   0x7   : > { %s31_s27 = sadd.s32 1, %s1058_s24  ;;  %s150_s28 = sadd.s32 1, %s1050_s22 }
   0x8   : > { %p33_p0 = scmp.ge.s32.totalorder %s31_s27, 4  ;;  %p160_p1 = scmp.ne.s32.totalorder %s1050_s22, %s1046_s21 }
   0x9   : > { %p161_p2 = scmp.eq.s32.totalorder %s784_s0, 3  ;;  %p166_p3 = scmp.ne.s32.totalorder %s1046_s21, %s1042_s20 }
   0xa   : > { %s1435_s27 = smov (%p33_p0, %s31_s27), 0  ;;  %p167_p5 = scmp.eq.s32.totalorder %s785_s26, 3 }
   0xb   : > { %p1142_p4 = por %p161_p2, %p160_p1  ;;  %s147_s30 = ssub.s32 %s1058_s24, %s1435_s27 }
   0xc   : > { %p788_p6 = scmp.ge.s32.totalorder %s1062_s25, 1  ;;  %p148_p7 = scmp.eq.s32.totalorder %s147_s30, 0 }
   0xd   : > { %p1149_p8 = por %p167_p5, %p166_p3  ;;  %p210_p9 = scmp.lt.s32.totalorder %s1062_s25, 5 }
   0xe   : > { %s1155_s7 = scalar_select %p148_p7, %s1050_s22, %s150_s28  }
   0xf   : > { %p211_p10 = pnand %p788_p6, %p210_p9 }
  0x10   : > { %s253_s10 = scalar_lea.vmem (!%p211_p10), %s1421_s2, %s1054_s23  ;;  %vm255_vm0 = vcmask (!%p211_p10), 57344   ;;  %v1165_v2 = vld [vmem:[%s1422_s3] sm:$0xff] (!%p211_p10)  ;;  %v1170_v3 = vld [vmem:[%s1422_s3 + $0x8] sm:$0xff] (!%p211_p10)  ;;  %vm283_vm1 = vcmask (!%p211_p10), 64512   ;;  %v1064_v4 = vmov (!%p211_p10), 0.0|0.0   ;;  %v1185_v7 = vld [vmem:[%s1422_s3 + $0x10] sm:$0xff] (!%p211_p10) }
  0x11   : > { %214 = sbr.rel (%p211_p10) target bundleno = 1020 (0x3fc), region = 40  ;;  %v254_v0 = vld [vmem:[%s253_s10] sm:$0x1] (!%p211_p10)  ;;  %876 = vmatprep.subr.bf16.mxu0 (!%p211_p10), %v1064_v4  ;;  %v877_v5 = vpack.c.bf16 (!%p211_p10), %v1170_v3, %v1165_v2  ;;  %vm1176_vm2 = vmpackc.low (!%p211_p10), %vm283_vm1, %vm283_vm1  ;;  %908 = vmatprep.subr.bf16.mxu1 (!%p211_p10), %v1064_v4  ;;  %v1190_v8 = vld [vmem:[%s1422_s3 + $0x18] sm:$0xff] (!%p211_p10)  ;;  %vm1065_vm3 = vmmov (!%p211_p10), 0   ;;  %v1066_v33 = vmov (!%p211_p10), 0.0  }
  0x12   : > { %v256_v1 = vsel (!%p211_p10), %vm255_vm0, %v254_v0, -inf  ;;  %v881_v9 = vpack.c.bf16 (!%p211_p10), %v1190_v8, %v1185_v7  ;;  %v1199_v10 = vld [vmem:[%s1422_s3 + $0x20] sm:$0xff] (!%p211_p10)  ;;  %v1204_v11 = vld [vmem:[%s1422_s3 + $0x28] sm:$0xff] (!%p211_p10)  ;;  %v1213_v13 = vld [vmem:[%s1422_s3 + $0x30] sm:$0xff] (!%p211_p10)  ;;  %866 = vmatprep.mubr.msk.f32.mxu0 (!%p211_p10), %vm1065_vm3, %v1066_v33  ;;  %873 = vmatprep.mubr.msk.f32.mxu1 (!%p211_p10), %vm1065_vm3, %v1066_v33  ;;  %p243_p11 = scmp.lt.s32.totalorder (!%p211_p10), %s1054_s23, 3  ;;  %v1067_v41 = vmov (!%p211_p10), 0  }
  0x13   : > { %257 = vmax.xlane.f32.xlu0 (!%p211_p10), %v256_v1  ;;  %879 = vmatpush3.bf16.xpose.msk.msra.mxu0 (!%p211_p10), %vm1176_vm2, %v877_v5  ;;  %v885_v12 = vpack.c.bf16 (!%p211_p10), %v1204_v11, %v1199_v10  ;;  %v1218_v14 = vld [vmem:[%s1422_s3 + $0x38] sm:$0xff] (!%p211_p10)  ;;  %v1227_v16 = vld [vmem:[%s1422_s3 + $0x40] sm:$0xff] (!%p211_p10)  ;;  %v1232_v17 = vld [vmem:[%s1422_s3 + $0x48] sm:$0xff] (!%p211_p10)  ;;  %vm494_vm5 = vcmask (!%p211_p10), 122880   ;;  %s252_s16 = sld [smem:[#allocation2]] (!%p211_p10)  ;;  %s239_s17 = sand.u32 (!%p211_p10), 1, %s1046_s21  }
  0x14   : > { %880 = vmatprep.subr.bf16.mxu0 (!%p211_p10), %v1064_v4  ;;  %v889_v15 = vpack.c.bf16 (!%p211_p10), %v1218_v14, %v1213_v13  ;;  %v893_v18 = vpack.c.bf16 (!%p211_p10), %v1232_v17, %v1227_v16  ;;  %v1241_v19 = vld [vmem:[%s1422_s3 + $0x50] sm:$0xff] (!%p211_p10)  ;;  %v1246_v20 = vld [vmem:[%s1422_s3 + $0x58] sm:$0xff] (!%p211_p10)  ;;  %v1255_v22 = vld [vmem:[%s1422_s3 + $0x60] sm:$0xff] (!%p211_p10)  ;;  %974 = vset.pattern.permute.xlu1 (!%p211_p10), %v1067_v41  ;;  %s789_s18 = sshll.u32 (!%p211_p10), %s239_s17, 3  ;;  %s810_s30 = sshll.u32 (!%p211_p10), %s1054_s23, 7 }
  0x15   : > { %v897_v21 = vpack.c.bf16 (!%p211_p10), %v1246_v20, %v1241_v19  ;;  %v1260_v23 = vld [vmem:[%s1422_s3 + $0x68] sm:$0xff] (!%p211_p10)  ;;  %v1270_v30 = vld [vmem:[%s1422_s3 + $0x70] sm:$0xff] (!%p211_p10)  ;;  %v1275_v31 = vld [vmem:[%s1422_s3 + $0x78] sm:$0xff] (!%p211_p10)  ;;  %975 = vset.pattern.permute.xlu0 (!%p211_p10), %v1067_v41  ;;  %s241_s8 = scalar_lea.vmem (!%p211_p10), [#allocation3], %s789_s18  ;;  %s697_s13 = scalar_lea.sflag (!%p211_p10), [#allocation4], %s239_s17 }
  0x16   : > { %v901_v24 = vpack.c.bf16 (!%p211_p10), %v1260_v23, %v1255_v22  ;;  %v905_v32 = vpack.c.bf16 (!%p211_p10), %v1275_v31, %v1270_v30  ;;  %v517_v40 = vld [vmem:[%s1423_s4] sm:$0xff] (!%p211_p10)  ;;  %v519_v42 = vld [vmem:[%s1423_s4 + $0x10] sm:$0xff] (!%p211_p10)  ;;  %v518_v43 = vld [vmem:[%s1423_s4 + $0x8] sm:$0xff] (!%p211_p10)  ;;  %s710_s9 = sshll.u32 (!%p211_p10), %s241_s8, 4  ;;  %s1374_s9 = int_to_ptr.vmem [resolvable:$true] %s710_s9 }
  0x17   : > { %535 = vperm.xlu1 (!%p211_p10), %974, %v517_v40   ;;  %v531_v44 = vld [vmem:[%s1423_s4 + $0x70] sm:$0xff] (!%p211_p10)  ;;  %v520_v45 = vld [vmem:[%s1423_s4 + $0x18] sm:$0xff] (!%p211_p10)  ;;  %v521_v46 = vld [vmem:[%s1423_s4 + $0x20] sm:$0xff] (!%p211_p10)  ;;  %s984_s14 = scalar_lea.vmem (!%p211_p10), %s1374_s9, 128 }
  0x18   : > { %s244_s11 = scalar_select %p243_p11, %s1054_s23, 3  ;;  %v522_v47 = vld [vmem:[%s1423_s4 + $0x28] sm:$0xff]  ;;  %v523_v48 = vld [vmem:[%s1423_s4 + $0x30] sm:$0xff]  ;;  %v524_v49 = vld [vmem:[%s1423_s4 + $0x38] sm:$0xff] }
  0x19   : > { %v525_v50 = vld [vmem:[%s1423_s4 + $0x40] sm:$0xff]  ;;  %v526_v51 = vld [vmem:[%s1423_s4 + $0x48] sm:$0xff]  ;;  %v527_v52 = vld [vmem:[%s1423_s4 + $0x50] sm:$0xff]  ;;  %p685_p12 = scmp.gt.f32.partialorder %s252_s16, 0.0  ;;  %p985_p13 = scmp.ne.s32.totalorder %s1374_s9, %s984_s14 }
  0x1a   : > { %s813_s12 = sshll.u32 %s244_s11, 4  ;;  %v528_v53 = vld [vmem:[%s1423_s4 + $0x58] sm:$0xff]  ;;  %v529_v54 = vld [vmem:[%s1423_s4 + $0x60] sm:$0xff]  ;;  %v530_v55 = vld [vmem:[%s1423_s4 + $0x68] sm:$0xff]  ;;  %s1068_s23 = smov [#allocation3]  }
  0x1b   : > { %883 = vmatpush3.bf16.xpose.msk.msra.mxu0 %vm1176_vm2, %v881_v9  ;;  %s250_s15 = scalar_lea.vmem %s1420_s1, %s813_s12  ;;  %540 = vperm.xlu1 %974, %v518_v43   ;;  %v532_v56 = vld [vmem:[%s1423_s4 + $0x78] sm:$0xff]  ;;  %s1372_s12 = scalar_lea.hbm %s1424_s5, %s810_s30 }
  0x1c   : > { %884 = vmatprep.subr.bf16.mxu0 %v1064_v4  ;;  %v406_v34 = vld [vmem:[%s250_s15] sm:$0xff]  ;;  %v407_v35 = vld [vmem:[%s250_s15 + $0x8] sm:$0xff]  ;;  %p986_p0 = pnand %p985_p13, %p1142_p4  ;;  %s988_s15 = sshll.u32 %s1068_s23, 4  ;;  %s989_s15 = int_to_ptr.vmem [resolvable:$false] %s988_s15 }
  0x1d   : > { %v909_v36 = vpack.c.bf16 %v407_v35, %v406_v34  ;;  %p991_p2 = scmp.lt.s32.totalorder %s1374_s9, %s989_s15 }
  0x1e   : > { %p987_p1 = pneg %p986_p0 }
  0x1f   : > { %910 = vmatpush3.bf16.xpose.msra.mxu1 %v909_v36  ;;  %550 = vperm.xlu1 %974, %v520_v45  }
  0x23   : > { %887 = vmatpush3.bf16.xpose.msk.msra.mxu0 %vm1176_vm2, %v885_v12  ;;  %555 = vperm.xlu1 %974, %v521_v46  }
  0x24   : > { %888 = vmatprep.subr.bf16.mxu0 %v1064_v4 }
  0x27   : > { %560 = vperm.xlu1 %974, %v522_v47  }
  0x2b   : > { %891 = vmatpush3.bf16.xpose.msk.msra.mxu0 %vm1176_vm2, %v889_v15  ;;  %565 = vperm.xlu1 %974, %v523_v48  }
  0x2c   : > { %892 = vmatprep.subr.bf16.mxu0 %v1064_v4 }
  0x2f   : > { %570 = vperm.xlu1 %974, %v524_v49  }
  0x33   : > { %895 = vmatpush3.bf16.xpose.msk.msra.mxu0 %vm1176_vm2, %v893_v18  ;;  %575 = vperm.xlu1 %974, %v525_v50  }
  0x34   : > { %896 = vmatprep.subr.bf16.mxu0 %v1064_v4 }
  0x37   : > { %580 = vperm.xlu1 %974, %v526_v51  }
  0x3b   : > { %899 = vmatpush3.bf16.xpose.msk.msra.mxu0 %vm1176_vm2, %v897_v21  ;;  %585 = vperm.xlu1 %974, %v527_v52  }
  0x3c   : > { %900 = vmatprep.subr.bf16.mxu0 %v1064_v4 }
  0x3f   : > { %590 = vperm.xlu1 %974, %v528_v53  }
  0x43   : > { %903 = vmatpush3.bf16.xpose.msk.msra.mxu0 %vm1176_vm2, %v901_v24  ;;  %595 = vperm.xlu1 %974, %v529_v54  }
  0x44   : > { %904 = vmatprep.subr.bf16.mxu0 %v1064_v4 }
  0x47   : > { %600 = vperm.xlu1 %974, %v530_v55  }
  0x4b   : > { %907 = vmatpush3.bf16.xpose.msk.msra.mxu0 %vm1176_vm2, %v905_v32  ;;  %610 = vperm.xlu1 %974, %v532_v56  }
  0x96   : > { %v536_v60 = vpop.permute.xlu1 %535 }
  0x97   : > { %v613_v61 = vsub.f32 %v1165_v2, %v536_v60 }
  0x9a   : > { %v541_v1 = vpop.permute.xlu1 %540 }
  0x9b   : > { %v614_v4 = vsub.f32 %v1170_v3, %v541_v1 }
  0x9d   : > { %v630_v9 = vmul.f32 %v614_v4, %v614_v4 }
  0x9e   : > { %v551_v12 = vpop.permute.xlu1 %550 }
  0x9f   : > { %v646_v15 = vsel %vm283_vm1, %v630_v9, 0.0  ;;  %v616_v18 = vsub.f32 %v1190_v8, %v551_v12 }
  0xa0   : > { %v258_v25 = vpop.xlane.xlu0 %257 }
  0xa1   : > { %v259_v26 = vsub.f32 %v254_v0, %v258_v25  ;;  %v629_v0 = vmul.f32 %v613_v61, %v613_v61  ;;  %v632_v2 = vmul.f32 %v616_v18, %v616_v18 }
  0xa2   : > { %v556_v25 = vpop.permute.xlu1 %555 }
  0xa3   : > { %v260_v27 = vmul.f32 1.442695, %v259_v26  ;;  %v645_v6 = vsel %vm283_vm1, %v629_v0, 0.0 }
  0xa4   : > { %v647_v24 = vadd.f32 %v646_v15, %v645_v6 }
  0xa5   : > { %976 = vpow2.f32 %v260_v27  ;;  %v617_v27 = vsub.f32 %v1199_v10, %v556_v25 }
  0xaf   : > { %v977_v28 = vpop.eup %976 }
  0xb0   : > { %v262_v29 = vsel %vm255_vm0, %v977_v28, 0.0 }
  0xb1   : > { %263 = vadd.xlane.f32.xlu0 %v262_v29  ;;  %v561_v29 = vpop.permute.xlu1 %560 }
  0xb2   : > { %v618_v33 = vsub.f32 %v1204_v11, %v561_v29 }
  0xb4   : > { %v634_v35 = vmul.f32 %v618_v33, %v618_v33 }
  0xb5   : > { %v566_v8 = vpop.permute.xlu1 %565 }
  0xb6   : > { %v654_v36 = vsel %vm283_vm1, %v634_v35, 0.0 }
  0xb9   : > { %v571_v40 = vpop.permute.xlu1 %570 }
  0xba   : > { %v620_v10 = vsub.f32 %v1218_v14, %v571_v40 }
  0xbc   : > { %v636_v43 = vmul.f32 %v620_v10, %v620_v10 }
  0xbe   : > { %v658_v45 = vsel %vm283_vm1, %v636_v43, 0.0 }
  0xc7   : > { %545 = vperm.xlu0 %975, %v519_v42  }
  0xcb   : > { %605 = vperm.xlu0 %975, %v531_v44   ;;  %v576_v44 = vpop.permute.xlu1 %575 }
  0xcc   : > { %v621_v11 = vsub.f32 %v1227_v16, %v576_v44 }
  0xce   : > { %v637_v47 = vmul.f32 %v621_v11, %v621_v11 }
  0xcf   : > { %v581_v48 = vpop.permute.xlu1 %580 }
  0xd0   : > { %v660_v49 = vsel %vm283_vm1, %v637_v47, 0.0 }
  0xd3   : > { %v586_v52 = vpop.permute.xlu1 %585 }
  0xd4   : > { %v623_v14 = vsub.f32 %v1241_v19, %v586_v52 }
  0xd6   : > { %v639_v55 = vmul.f32 %v623_v14, %v623_v14 }
  0xd7   : > { %v591_v56 = vpop.permute.xlu1 %590 }
  0xd8   : > { %v624_v16 = vsub.f32 %v1246_v20, %v591_v56 }
  0xda   : > { %v640_v60 = vmul.f32 %v624_v16, %v624_v16 }
  0xdb   : > { %v596_v61 = vpop.permute.xlu1 %595 }
  0xdf   : > { %v601_v19 = vpop.permute.xlu1 %600 }
  0xe3   : > { %v611_v12 = vpop.permute.xlu1 %610 }
 0x13e   : > { %v264_v37 = vpop.xlane.xlu0 %263 }
 0x13f   : > { %978 = vrcp.f32 %v264_v37  ;;  %v619_v37 = vsub.f32 %v1213_v13, %v566_v8  ;;  %v622_v13 = vsub.f32 %v1232_v17, %v581_v48  ;;  %v666_v17 = vsel %vm283_vm1, %v640_v60, 0.0 }
 0x141   : > { %v638_v51 = vmul.f32 %v622_v13, %v622_v13 }
 0x143   : > { %v662_v53 = vsel %vm283_vm1, %v638_v51, 0.0 }
 0x146   : > { %v546_v62 = vpop.permute.xlu0 %545 }
 0x147   : > { %v615_v63 = vsub.f32 %v1185_v7, %v546_v62  ;;  %v650_v7 = vsel %vm283_vm1, %v632_v2, 0.0  ;;  %v625_v62 = vsub.f32 %v1255_v22, %v596_v61 }
 0x149   : > { %v979_v38 = vpop.eup %978  ;;  %v631_v5 = vmul.f32 %v615_v63, %v615_v63  ;;  %v641_v1 = vmul.f32 %v625_v62, %v625_v62 }
 0x14a   : > { %v266_v39 = vmul.f32 %v979_v38, %v977_v28  ;;  %v633_v28 = vmul.f32 %v617_v27, %v617_v27 }
 0x14b   : > { %v648_v21 = vsel %vm283_vm1, %v631_v5, 0.0  ;;  %v668_v4 = vsel %vm283_vm1, %v641_v1, 0.0  ;;  %v626_v5 = vsub.f32 %v1260_v23, %v601_v19 }
 0x14c   : > { %867 = vmatmul.mubr.msk.f32.vlgmr.msra.gmra.mrb[0].mxu0 %vm283_vm1, %v266_v39  ;;  %v649_v26 = vadd.f32 %v648_v21, %v647_v24  ;;  %v652_v32 = vsel %vm283_vm1, %v633_v28, 0.0  ;;  %v635_v39 = vmul.f32 %v619_v37, %v619_v37  ;;  %v628_v21 = vsub.f32 %v1275_v31, %v611_v12 }
 0x14d   : > { %v642_v20 = vmul.f32 %v626_v5, %v626_v5 }
 0x14e   : > { %v651_v3 = vadd.f32 %v650_v7, %v649_v26  ;;  %v656_v41 = vsel %vm283_vm1, %v635_v39, 0.0  ;;  %v644_v24 = vmul.f32 %v628_v21, %v628_v21 }
 0x14f   : > { %v670_v15 = vsel %vm283_vm1, %v642_v20, 0.0 }
 0x150   : > { %v653_v34 = vadd.f32 %v652_v32, %v651_v3  ;;  %v674_v2 = vsel %vm283_vm1, %v644_v24, 0.0  ;;  %v487_v32 = vlaneseq }
 0x152   : > { %v655_v38 = vadd.f32 %v654_v36, %v653_v34  ;;  %v488_v33 = vand.u32 127, %v487_v32  ;;  %v507_v13 = vshrl.u32 %v487_v32, 7 }
 0x154   : > { %v657_v42 = vadd.f32 %v656_v41, %v655_v38  ;;  %vm492_vm4 = vcmp.lt.s32.totalorder %v488_v33, 16  ;;  %vm508_vm6 = vcmp.eq.s32.totalorder %v507_v13, 0  ;;  %vm509_vm7 = vcmp.eq.s32.totalorder %v488_v33, 0 }
 0x155   : > { %vm511_vm8 = vcmp.eq.s32.totalorder %v488_v33, 1  ;;  %vm510_vm9 = vmand %vm508_vm6, %vm509_vm7 }
 0x156   : > { %v659_v46 = vadd.f32 %v658_v45, %v657_v42  ;;  %vm512_vm10 = vmand %vm508_vm6, %vm511_vm8 }
 0x158   : > { %v661_v50 = vadd.f32 %v660_v49, %v659_v46 }
 0x15a   : > { %v663_v54 = vadd.f32 %v662_v53, %v661_v50 }
 0x21f   : > { %v401_v57 = vpop.f32.mrb[0].mxu0 }
 0x220   : > { %v405_v58 = vmul.f32 0.01, %v401_v57  ;;  %v868_v59 = vpop.f32.mrb[1].mxu0  ;;  %v664_v57 = vsel %vm283_vm1, %v639_v55, 0.0 }
 0x221   : > { %v606_v59 = vpop.permute.xlu0 %605 }
 0x222   : > { %874 = vmatmul.mubr.f32.vlgmr.msra.gmra.mrb[0].mxu1 %v405_v58  ;;  %v665_v58 = vadd.f32 %v664_v57, %v663_v54  ;;  %v627_v63 = vsub.f32 %v1270_v30, %v606_v59 }
 0x224   : > { %v667_v0 = vadd.f32 %v666_v17, %v665_v58  ;;  %v643_v6 = vmul.f32 %v627_v63, %v627_v63 }
 0x226   : > { %v669_v9 = vadd.f32 %v668_v4, %v667_v0  ;;  %v672_v18 = vsel %vm283_vm1, %v643_v6, 0.0 }
 0x228   : > { %v671_v22 = vadd.f32 %v670_v15, %v669_v9 }
 0x22a   : > { %v673_v30 = vadd.f32 %v672_v18, %v671_v22 }
 0x22c   : > { %v675_v25 = vadd.f32 %v674_v2, %v673_v30 }
 0x22e   : > { %676 = vadd.xlane.f32.xlu1 %v675_v25 }
 0x2bb   : > { %v677_v38 = vpop.xlane.xlu1 %676 }
 0x2bc   : > { %v678_v39 = vrot.slane %v677_v38, 4 }
 0x2be   : > { %v679_v40 = vadd.f32 %v678_v39, %v677_v38 }
 0x2c0   : > { %v680_v41 = vrot.slane %v679_v40, 2 }
 0x2c2   : > { %v681_v44 = vadd.f32 %v680_v41, %v679_v40 }
 0x2c4   : > { %v682_v46 = vrot.slane %v681_v44, 1 }
 0x2c6   : > { %v683_v49 = vadd.f32 %v682_v46, %v681_v44 }
 0x2f5   : > { %v474_v26 = vpop.f32.mrb[0].mxu1 }
 0x2f6   : > { %v479_v7 = vand.u32 2147483647, %v474_v26  ;;  %v875_v23 = vpop.f32.mrb[1].mxu1  ;;  %v478_v31 = vmin.f32 %v474_v26, 0.0 }
 0x2f8   : > { %v480_v27 = vsub.f32 0.0, %v479_v7 }
 0x2fa   : > { %v481_v3 = vmul.f32 1.442695, %v480_v27 }
 0x2fc   : > { %980 = vpow2.f32 %v481_v3 }
 0x306   : > { %v981_v28 = vpop.eup %980 }
 0x307   : > { %v483_v29 = vadd.f32 1.0, %v981_v28 }
 0x309   : > { %982 = vlog2.f32 %v483_v29 }
 0x313   : > { %v983_v34 = vpop.eup %982 }
 0x314   : > { %v485_v35 = vmul.f32 0.6931472, %v983_v34 }
 0x316   : > { %v486_v8 = vsub.f32 %v478_v31, %v485_v35 }
 0x318   : > { %v493_v36 = vsel %vm492_vm4, %v486_v8, 0.0 }
 0x319   : > { %v495_v37 = vsel %vm494_vm5, %v493_v36, 0.0 }
 0x31a   : > { %496 = vadd.xlane.f32.xlu0 %v495_v37 }
 0x3a7   : > { %v497_v10 = vpop.xlane.xlu0 %496 }
 0x3a8   : > { %v498_v42 = vrot.slane %v497_v10, 4 }
 0x3aa   : > { %v499_v43 = vadd.f32 %v498_v42, %v497_v10 }
 0x3ac   : > { %v500_v45 = vrot.slane %v499_v43, 2 }
 0x3ae   : > { %v501_v11 = vadd.f32 %v500_v45, %v499_v43 }
 0x3b0   : > { %v502_v47 = vrot.slane %v501_v11, 1 }
 0x3b2   : > { %v503_v48 = vadd.f32 %v502_v47, %v501_v11 }
 0x3b4   : > { %911 = vpush %v503_v48 }
 0x3b5   : > { %913 = vpush %v683_v49 }
 0x3e5   : > { %s912_s19 = spop %911 }
 0x3e6   : > { %s505_s0 = smul.f32 -0.0625, %s912_s19  ;;  %s914_s26 = spop %913 }
 0x3e7   : > { %s686_s28 = smul.f32 %s914_s26, %s252_s16  ;;  %s990_s16 = scalar_lea.vmem %s989_s15, 256 }
 0x3e8   : > { %v692_v50 = vstv %s505_s0  ;;  %p992_p3 = scmp.lt.s32.totalorder %s990_s16, %s984_s14 }
 0x3e9   : > { %s1437_s28 = smov (!%p685_p12, %s686_s28), 0.0  ;;  %v693_v52 = vsel %vm510_vm9, %v692_v50, 0.0 }
 0x3ea   : > { %v688_v51 = vstv %s1437_s28  ;;  %p993_p5 = por %p992_p3, %p991_p2 }
 0x3eb   : > { %v689_v53 = vsel %vm512_vm10, %v688_v51, 0.0 }
 0x3ec   : > { %v694_v14 = vadd.f32 %v693_v52, %v689_v53  ;;  %p994_p6 = pnand %p993_p5, %p987_p1 }
 0x3ee   : > { %695 = vst [vmem:[%s241_s8] sm:$0xff] %v694_v14 }
 0x3ef   : > { %997 = shalt.err (!%p994_p6)
}
 0x3f0   : > { %s998_s17 = scalar_lea.hbm %s1372_s12, 128  ;;  %s1002_s0 = scalar_lea.hbm %s1424_s5, 512 }
 0x3f1   : > { %p999_p7 = scmp.ne.s32.totalorder %s1372_s12, %s998_s17  ;;  %p1003_p11 = scmp.lt.u32.totalorder %s1372_s12, %s1424_s5 }
 0x3f2   : > { %p1004_p12 = scmp.lt.u32.totalorder %s1002_s0, %s998_s17  ;;  %p1006_p0 = scmp.lt.u32.totalorder %s998_s17, %s1372_s12 }
 0x3f3   : > { %p1000_p9 = pnand %p999_p7, %p1142_p4 }
 0x3f4   : > { %p1005_p13 = por %p1004_p12, %p1003_p11 }
 0x3f5   : > { %p1001_p10 = pneg %p1000_p9 }
 0x3f6   : > { %p1007_p1 = por %p1006_p0, %p1005_p13 }
 0x3f8   : > { %p1008_p2 = pnand %p1007_p1, %p1001_p10 }
 0x3fa   : > { %1011 = shalt.err (!%p1008_p2)
}
 0x3fb   : > { %915 = dma.vmem_to_hbm [thread:$0]  (%p1142_p4), %s1374_s9, 128, %s1372_s12, %s697_s13  }
 0x3fc PF: > { %p921_p3 = scmp.ge.s32.totalorder %s1062_s25, 2  ;;  %s722_s30 = sand.u32 1, %s1042_s20  }
 0x3fd   : > { %s723_s8 = scalar_lea.sflag [#allocation4], %s722_s30 }
 0x3fe   : > { %p918_p5 = pnand %p921_p3, %p1149_p8 }
 0x400   : > { %1037 = dma.done.wait (!%p918_p5), %s723_s8, 128  }
 0x401   : > { %1039 = vsyncadd (!%p918_p5), %s723_s8, 4294967168  ;;  %s19_s25 = sadd.s32 1, %s1062_s25   ;;  %s1429_s20 = smov %s1046_s21 }
 0x402   : > { %p16_p6 = scmp.ge.s32.totalorder %s19_s25, 6   ;;  %s1430_s21 = smov %s1050_s22 }
 0x403   : > { %s1431_s22 = smov %s1155_s7  ;;  %s1432_s23 = smov %s1058_s24 }
 0x404   : > { %s1433_s24 = smov %s1435_s27  ;;  %18 = sbr.rel (!%p16_p6) target bundleno = 6 (0x6), region = 80 }
 0x40b   :  { %728 = vsyncpa [#allocation4], 1 }
 0x40c   :  { %730 = vsyncpa [#allocation4 + $0x1], 1 }

</bundles_post_ra>
